<compile_context>
chip_gen: v7x
topology: tpu7x:2x2x1
jax: 0.10.0
libtpu: 0.0.40
codegen_flags: <defaults>
</compile_context>

<pallas_src>
import math
from functools import partial

import jax
import jax.numpy as jnp
from jax.experimental import pallas as pl
from jax.experimental.pallas import tpu as pltpu


def _round_up(a, b):
    return -(-a // b) * b


# ---------------------------------------------------------------------------
# Fused kernel:  out = ReLU( adj @ (X @ W) + bias ), K-tiled, f32 accumulator
# ---------------------------------------------------------------------------
def _gcn_fused_kernel(adj_ref, x_ref, w_ref, b_ref, o_ref, acc_ref, *,
                      n_valid, tk, mask_k, apply_act):
    k = pl.program_id(1)

    adj_t = adj_ref[...]          # (tn, tk)   compute dtype
    x_t = x_ref[...]              # (tk, fin)  compute dtype

    if mask_k:
        # Last K tile is ragged: zero the out-of-range columns of adj and the
        # out-of-range rows of X (OOB reads are unspecified -> must be masked
        # before they feed a reduction).  For full tiles the mask is all-true.
        valid = n_valid - k * tk
        col = jax.lax.broadcasted_iota(jnp.int32, adj_t.shape, 1)
        adj_t = jnp.where(col < valid, adj_t, jnp.zeros_like(adj_t))
        row = jax.lax.broadcasted_iota(jnp.int32, x_t.shape, 0)
        x_t = jnp.where(row < valid, x_t, jnp.zeros_like(x_t))

    # support tile computed on the fly (fin is tiny -> ~free on the MXU)
    s = jnp.dot(x_t, w_ref[...], preferred_element_type=jnp.float32)
    prod = jnp.dot(adj_t, s.astype(adj_t.dtype),
                   preferred_element_type=jnp.float32)

    @pl.when(k == 0)
    def _():
        acc_ref[...] = prod            # init with first product (no zero+add)

    @pl.when(k != 0)
    def _():
        acc_ref[...] += prod

    @pl.when(k == pl.num_programs(1) - 1)
    def _():
        out = acc_ref[...] + b_ref[...]          # bias in f32
        if apply_act:
            out = jnp.maximum(out, 0.0)          # ReLU (module default act)
        o_ref[...] = out.astype(o_ref.dtype)


def graph_convolution(
    x,
    adj,
    weight,
    bias=None,
    *,
    tile_n=512,           # output-row tile (multiple of 8, >=128 recommended)
    tile_k=1024,          # contraction tile over N (multiple of 128)
    compute_dtype=None,   # e.g. jnp.bfloat16 to halve adj HBM traffic
    apply_act=True,
):
    """output = ReLU(adj @ (x @ weight) + bias), matching GraphConvolution.forward."""
    N, fin = x.shape
    fin_w, fout = weight.shape
    assert fin == fin_w and adj.shape == (N, N)
    assert tile_n % 8 == 0 and tile_n >= 128, "tile_n: multiple of 8, >=128"
    assert tile_k % 128 == 0, "tile_k must be a multiple of 128"

    out_dtype = x.dtype
    cdt = jnp.dtype(compute_dtype) if compute_dtype is not None else jnp.dtype(adj.dtype)

    fout_p = _round_up(fout, 128)          # lane-dense output columns

    # Tile selection decoupled from N: ragged edges are masked in-kernel.
    tn = tile_n if N > tile_n else N
    tk = tile_k if N > tile_k else N
    num_row = pl.cdiv(N, tn)
    num_k = pl.cdiv(N, tk)
    mask_k = (N % tk) != 0

    # No full-matrix pad of adj; cast only if the compute dtype differs.
    # (For multi-layer GCNs, cast adj once per graph outside this call.)
    adj_c = adj if adj.dtype == cdt else adj.astype(cdt)
    x_c = x if x.dtype == cdt else x.astype(cdt)
    wp = jnp.pad(weight.astype(cdt), ((0, 0), (0, fout_p - fout)))      # tiny
    if bias is not None:
        bp = jnp.pad(bias.astype(jnp.float32), (0, fout_p - fout)).reshape(1, fout_p)
    else:
        bp = jnp.zeros((1, fout_p), jnp.float32)

    itemsize = cdt.itemsize
    out_itemsize = jnp.dtype(out_dtype).itemsize

    # VMEM budget for this tiling (double-buffered inputs/outputs + acc),
    # capped below v7x's 64 MiB physical VMEM.
    est_vmem = (2 * (tn * tk + tk * fin + fin * fout_p) * itemsize
                + 2 * fout_p * 4
                + 2 * tn * fout_p * out_itemsize
                + tn * fout_p * 4)
    vmem_limit = int(min(max(2 * est_vmem, 16 << 20), 48 << 20))

    cost = pl.CostEstimate(
        flops=2 * N * N * fout_p + 2 * num_row * N * fin * fout_p,
        transcendentals=0,
        bytes_accessed=(N * N * itemsize                       # adj streamed once
                        + num_row * N * fin * itemsize         # X re-streamed per row tile
                        + fin * fout_p * itemsize              # resident W
                        + N * fout_p * out_itemsize),          # output
    )

    outp = pl.pallas_call(
        partial(_gcn_fused_kernel, n_valid=N, tk=tk, mask_k=mask_k,
                apply_act=apply_act),
        out_shape=jax.ShapeDtypeStruct((N, fout_p), out_dtype),
        grid_spec=pltpu.PrefetchScalarGridSpec(
            num_scalar_prefetch=0,
            grid=(num_row, num_k),
            in_specs=[
                pl.BlockSpec((tn, tk), lambda i, k: (i, k)),      # adj row/K tile
                pl.BlockSpec((tk, fin), lambda i, k: (k, 0)),     # X K tile
                pl.BlockSpec((fin, fout_p), lambda i, k: (0, 0)), # W (resident)
                pl.BlockSpec((1, fout_p), lambda i, k: (0, 0)),   # bias row
            ],
            out_specs=pl.BlockSpec((tn, fout_p), lambda i, k: (i, 0)),
            scratch_shapes=[pltpu.VMEM((tn, fout_p), jnp.float32)],
        ),
        compiler_params=pltpu.CompilerParams(
            dimension_semantics=("parallel", "arbitrary"),
            vmem_limit_bytes=vmem_limit,
        ),
        cost_estimate=cost,
    )(adj_c, x_c, wp, bp)

    return outp if fout_p == fout else outp[:, :fout]


def _reference(x, adj, weight, bias):
    return jnp.maximum(adj @ (x @ weight) + bias, 0.0)


if __name__ == "__main__":
    # Small deterministic example; N not a multiple of 128, Fout not a
    # multiple of 128, so padding/masking paths are exercised.
    N = 300
    in_features = 16
    out_features = 48

    key = jax.random.PRNGKey(0)
    kx, ka, kw, kb = jax.random.split(key, 4)

    x = jax.random.normal(kx, (N, in_features), dtype=jnp.float32)
    # dense "adjacency": sparse random 0/1 + self loops, row-normalized
    adj_raw = (jax.random.uniform(ka, (N, N)) < 0.05).astype(jnp.float32)
    adj = adj_raw + jnp.eye(N, dtype=jnp.float32)
    adj = adj / jnp.sum(adj, axis=1, keepdims=True)

    # reset_parameters(): uniform(-stdv, stdv) with stdv = 1/sqrt(out_features)
    stdv = 1.0 / math.sqrt(out_features)
    weight = jax.random.uniform(
        kw, (in_features, out_features), minval=-stdv, maxval=stdv, dtype=jnp.float32
    )
    bias = jax.random.uniform(
        kb, (out_features,), minval=-stdv, maxval=stdv, dtype=jnp.float32
    )

    ref = _reference(x, adj, weight, bias)

    # 1) Default config: f32, whole graph fits a single (row, K) tile.
    out1 = jax.block_until_ready(graph_convolution(x, adj, weight, bias))
    assert out1.shape == (N, out_features)
    assert jnp.allclose(out1, ref, atol=1e-5, rtol=1e-5), "f32 default mismatch"

    # 2) Small tiles: multi-step K accumulation + in-kernel ragged-edge masking
    #    (N=300, tk=128 -> last K tile has 44 valid columns).
    out2 = jax.block_until_ready(
        graph_convolution(x, adj, weight, bias, tile_n=128, tile_k=128)
    )
    assert jnp.allclose(out2, ref, atol=1e-5, rtol=1e-5), "tiled f32 mismatch"

    # 3) bf16 streaming path (f32 accumulation) with masking.
    out3 = jax.block_until_ready(
        graph_convolution(
            x, adj, weight, bias, tile_n=128, tile_k=128, compute_dtype=jnp.bfloat16
        )
    )
    assert jnp.allclose(out3, ref, atol=3e-2, rtol=3e-2), "bf16 mismatch"

    print("KERNEL_OK")
</pallas_src>

<mosaic_0001>
module attributes {stable_mosaic.version = 11 : i64} {
  func.func @_gcn_fused_kernel(%arg0: i32, %arg1: i32, %arg2: memref<300x300xf32, #tpu.memory_space<vmem>>, %arg3: memref<300x16xf32, #tpu.memory_space<vmem>>, %arg4: memref<16x128xf32, #tpu.memory_space<vmem>>, %arg5: memref<1x128xf32, #tpu.memory_space<vmem>>, %arg6: memref<300x128xf32, #tpu.memory_space<vmem>>, %arg7: memref<300x128xf32, #tpu.memory_space<vmem>>) attributes {dimension_semantics = [#tpu.dimension_semantics<parallel>, #tpu.dimension_semantics<arbitrary>], iteration_bounds = array<i64: 1, 1>, scalar_prefetch = 0 : i64, scratch_operands = 1 : i64, tpu.core_type = #tpu.core_type<tc>, window_params = [{transform_indices = @transform_0, window_bounds = array<i64: 300, 300>}, {transform_indices = @transform_1, window_bounds = array<i64: 300, 16>}, {pipeline_mode = #tpu.pipeline_mode<synchronous>, transform_indices = @transform_2, window_bounds = array<i64: 16, 128>}, {pipeline_mode = #tpu.pipeline_mode<synchronous>, transform_indices = @transform_3, window_bounds = array<i64: 1, 128>}, {transform_indices = @transform_4, window_bounds = array<i64: 300, 128>}]} {
    %c0 = arith.constant 0 : index
    %c0_0 = arith.constant 0 : index
    %0 = vector.load %arg2[%c0, %c0_0] : memref<300x300xf32, #tpu.memory_space<vmem>>, vector<300x300xf32>
    %c0_1 = arith.constant 0 : index
    %c0_2 = arith.constant 0 : index
    %1 = vector.load %arg3[%c0_1, %c0_2] : memref<300x16xf32, #tpu.memory_space<vmem>>, vector<300x16xf32>
    %c0_3 = arith.constant 0 : index
    %c0_4 = arith.constant 0 : index
    %2 = vector.load %arg4[%c0_3, %c0_4] : memref<16x128xf32, #tpu.memory_space<vmem>>, vector<16x128xf32>
    %cst = arith.constant dense<0.000000e+00> : vector<300x128xf32>
    %3 = tpu.matmul %1, %2, %cst {dimension_numbers = #tpu.dot_dimension_numbers<[1], [0], [0], [1], [0, 0, 1, 1], [], []>} : vector<300x16xf32>, vector<16x128xf32>, vector<300x128xf32> -> vector<300x128xf32>
    %cst_5 = arith.constant dense<0.000000e+00> : vector<300x128xf32>
    %4 = tpu.matmul %0, %3, %cst_5 {dimension_numbers = #tpu.dot_dimension_numbers<[1], [0], [0], [1], [0, 0, 1, 1], [], []>} : vector<300x300xf32>, vector<300x128xf32>, vector<300x128xf32> -> vector<300x128xf32>
    %c0_i32 = arith.constant 0 : i32
    %5 = arith.cmpi eq, %arg1, %c0_i32 : i32
    %6 = arith.extui %5 : i1 to i32
    %c0_i32_6 = arith.constant 0 : i32
    %7 = arith.cmpi ne, %6, %c0_i32_6 : i32
    scf.if %7 {
      %c0_11 = arith.constant 0 : index
      %c0_12 = arith.constant 0 : index
      %14 = vector.load %arg7[%c0_11, %c0_12] : memref<300x128xf32, #tpu.memory_space<vmem>>, vector<300x128xf32>
      tpu.vector_store %arg7[%c0_11, %c0_12], %4 {strides = array<i32>} : memref<300x128xf32, #tpu.memory_space<vmem>>, vector<300x128xf32>,
    } else {
    }
    %c0_i32_7 = arith.constant 0 : i32
    %8 = arith.cmpi ne, %arg1, %c0_i32_7 : i32
    %9 = arith.extui %8 : i1 to i32
    %c0_i32_8 = arith.constant 0 : i32
    %10 = arith.cmpi ne, %9, %c0_i32_8 : i32
    scf.if %10 {
      %c0_11 = arith.constant 0 : index
      %c0_12 = arith.constant 0 : index
      %14 = vector.load %arg7[%c0_11, %c0_12] : memref<300x128xf32, #tpu.memory_space<vmem>>, vector<300x128xf32>
      %15 = arith.addf %14, %4 : vector<300x128xf32>
      %c0_13 = arith.constant 0 : index
      %c0_14 = arith.constant 0 : index
      %16 = vector.load %arg7[%c0_13, %c0_14] : memref<300x128xf32, #tpu.memory_space<vmem>>, vector<300x128xf32>
      tpu.vector_store %arg7[%c0_13, %c0_14], %15 {strides = array<i32>} : memref<300x128xf32, #tpu.memory_space<vmem>>, vector<300x128xf32>,
    } else {
    }
    %c0_i32_9 = arith.constant 0 : i32
    %11 = arith.cmpi eq, %arg1, %c0_i32_9 : i32
    %12 = arith.extui %11 : i1 to i32
    %c0_i32_10 = arith.constant 0 : i32
    %13 = arith.cmpi ne, %12, %c0_i32_10 : i32
    scf.if %13 {
      %c0_11 = arith.constant 0 : index
      %c0_12 = arith.constant 0 : index
      %14 = vector.load %arg7[%c0_11, %c0_12] : memref<300x128xf32, #tpu.memory_space<vmem>>, vector<300x128xf32>
      %c0_13 = arith.constant 0 : index
      %c0_14 = arith.constant 0 : index
      %15 = vector.load %arg5[%c0_13, %c0_14] : memref<1x128xf32, #tpu.memory_space<vmem>>, vector<1x128xf32>
      %16 = vector.broadcast %15 : vector<1x128xf32> to vector<300x128xf32>
      %17 = arith.addf %14, %16 : vector<300x128xf32>
      %cst_15 = arith.constant 0.000000e+00 : f32
      %18 = vector.broadcast %cst_15 : f32 to vector<300x128xf32>
      %19 = arith.maximumf %17, %18 : vector<300x128xf32>
      %c0_16 = arith.constant 0 : index
      %c0_17 = arith.constant 0 : index
      %20 = vector.load %arg6[%c0_16, %c0_17] : memref<300x128xf32, #tpu.memory_space<vmem>>, vector<300x128xf32>
      tpu.vector_store %arg6[%c0_16, %c0_17], %19 {strides = array<i32>} : memref<300x128xf32, #tpu.memory_space<vmem>>, vector<300x128xf32>,
    } else {
    }
    return
  }
  func.func @transform_0(%arg0: i32, %arg1: i32) -> (i32, i32) {
    %c0_i32 = arith.constant 0 : i32
    return %arg0, %arg1 : i32, i32
  }
  func.func @transform_1(%arg0: i32, %arg1: i32) -> (i32, i32) {
    %c0_i32 = arith.constant 0 : i32
    %c0_i32_0 = arith.constant 0 : i32
    return %arg1, %c0_i32 : i32, i32
  }
  func.func @transform_2(%arg0: i32, %arg1: i32) -> (i32, i32) {
    %c0_i32 = arith.constant 0 : i32
    %c0_i32_0 = arith.constant 0 : i32
    %c0_i32_1 = arith.constant 0 : i32
    return %c0_i32, %c0_i32_0 : i32, i32
  }
  func.func @transform_3(%arg0: i32, %arg1: i32) -> (i32, i32) {
    %c0_i32 = arith.constant 0 : i32
    %c0_i32_0 = arith.constant 0 : i32
    %c0_i32_1 = arith.constant 0 : i32
    return %c0_i32, %c0_i32_0 : i32, i32
  }
  func.func @transform_4(%arg0: i32, %arg1: i32) -> (i32, i32) {
    %c0_i32 = arith.constant 0 : i32
    %c0_i32_0 = arith.constant 0 : i32
    return %arg0, %c0_i32 : i32, i32
  }
}

</mosaic_0001>

<bundles_post_ra>
// kernel: tpu_custom_call.1
= control target key start
LH: loop header
LB: loop body
LE: loop exit
PB: predicated region body
PF: predicated region fallthrough
CT: control target
= control target key end

     0   :  { %9 = vsyncpa [#allocation4], 0  ;;  %s2334_s0 = inlined_call_operand.hbm [shape: f32[300,300], index: 0, kind: input, shape index: {}]   ;;  %s2335_s1 = inlined_call_operand.vmem [shape: f32[300,16], index: 1, kind: input, shape index: {}]   ;;  %s2336_s2 = inlined_call_operand.vmem [shape: f32[16,128], index: 2, kind: input, shape index: {}]   ;;  %s2337_s3 = inlined_call_operand.vmem [shape: f32[1,128], index: 3, kind: input, shape index: {}]   ;;  %s2338_s4 = inlined_call_operand.hbm [shape: f32[300,128], index: 4, kind: output, shape index: {}]  }
   0x1   :  { %10 = vsyncpa [#allocation5], 0  ;;  %s1970_s15 = smov [#allocation3]   ;;  %s1922_s19 = scalar_lea.hbm %s2334_s0, 14592 }
   0x2   :  { %s16_s16 = sshll.u32 %s1970_s15, 4  ;;  %p1923_p0 = scmp.ne.s32.totalorder %s2334_s0, %s1922_s19  ;;  %s17_s16 = int_to_ptr.vmem [resolvable:$true] %s16_s16 }
   0x3   :  { %p1926_p1 = scmp.lt.u32.totalorder %s1922_s19, %s2334_s0 }
   0x5   :  { %p1928_p2 = pnand %p1926_p1, %p1923_p0 }
   0x7   :  { %1931 = shalt.err (!%p1928_p2)
}
   0x8   :  { %s1932_s24 = scalar_lea.vmem %s17_s16, 14592  ;;  %p1937_p4 = scmp.lt.s32.totalorder %s17_s16, %s17_s16 }
   0x9   :  { %p1933_p3 = scmp.ne.s32.totalorder %s17_s16, %s1932_s24  ;;  %p1938_p5 = scmp.lt.s32.totalorder %s1932_s24, %s1932_s24 }
   0xb   :  { %p1939_p6 = por %p1938_p5, %p1937_p4 }
   0xd   :  { %p1940_p7 = pnand %p1939_p6, %p1933_p3 }
   0xf   :  { %1943 = shalt.err (!%p1940_p7)
}
  0x10   :  { %s1971_s25 = smov 384   ;;  %s1972_s26 = smov 24  }
  0x11   :  { %22 = dma.hbm_to_vmem [thread:$0]  %s2334_s0, 14592, %s17_s16, [#allocation4], %s1971_s25, %s1971_s25, %s1972_s26  }
  0x12   :  { %1966 = dma.done.wait [#allocation4], 14592  }
  0x13   :  { %1967 = vsyncadd [#allocation4], 4294952704  ;;  %vm186_vm0 = vcmask 130048   ;;  %v184_v0 = vld [vmem:[%s2336_s2] sm:$0xff]  ;;  %v185_v1 = vld [vmem:[%s2336_s2 + $0x8] sm:$0xff]  ;;  %v1973_v41 = vmov 0.0|0.0  }
  0x14   :  { %v146_v2 = vld [vmem:[%s2335_s1] sm:$0xff]  ;;  %v1816_v3 = vpack.c.bf16 %v185_v1, %v184_v0  ;;  %v147_v4 = vld [vmem:[%s2335_s1 + $0x8] sm:$0xff]  ;;  %v148_v5 = vld [vmem:[%s2335_s1 + $0x10] sm:$0xff]  ;;  %1882 = vmatprep.subr.bf16.mxu1 %v1973_v41  ;;  %vm671_vm1 = vcmask 1043456   ;;  %vm1974_vm2 = vmmov 1   ;;  %vm556_vm4 = vcmask 359424  }
  0x15   :  { %1690 = vmatprep.mubr.msk.f32.mxu0 %vm186_vm0, %v146_v2  ;;  %v149_v6 = vld [vmem:[%s2335_s1 + $0x18] sm:$0xff]  ;;  %v150_v7 = vld [vmem:[%s2335_s1 + $0x20] sm:$0xff]  ;;  %v151_v8 = vld [vmem:[%s2335_s1 + $0x28] sm:$0xff] }
  0x16   :  { %1817 = vmatprep.subr.bf16.mxu0 %v1816_v3  ;;  %v152_v9 = vld [vmem:[%s2335_s1 + $0x30] sm:$0xff]  ;;  %v153_v10 = vld [vmem:[%s2335_s1 + $0x38] sm:$0xff]  ;;  %v154_v11 = vld [vmem:[%s2335_s1 + $0x40] sm:$0xff] }
  0x17   :  { %1819 = vmatpush3.bf16.msra.mxu0 %v1816_v3  ;;  %v155_v12 = vld [vmem:[%s2335_s1 + $0x48] sm:$0xff]  ;;  %v156_v13 = vld [vmem:[%s2335_s1 + $0x50] sm:$0xff]  ;;  %v157_v14 = vld [vmem:[%s2335_s1 + $0x58] sm:$0xff] }
  0x18   :  { %v158_v15 = vld [vmem:[%s2335_s1 + $0x60] sm:$0xff]  ;;  %v159_v16 = vld [vmem:[%s2335_s1 + $0x68] sm:$0xff]  ;;  %v160_v17 = vld [vmem:[%s2335_s1 + $0x70] sm:$0xff]  ;;  %1820 = vmatprep.subr.bf16.mxu0 %v1973_v41 }
  0x19   :  { %v161_v18 = vld [vmem:[%s2335_s1 + $0x78] sm:$0xff]  ;;  %v162_v19 = vld [vmem:[%s2335_s1 + $0x80] sm:$0xff]  ;;  %v163_v20 = vld [vmem:[%s2335_s1 + $0x88] sm:$0xff] }
  0x1a   :  { %1691 = vmatmul.mubr.msk.f32.vlgmr.msra.gmra.mrb[0].mxu0 %vm186_vm0, %v147_v4  ;;  %v164_v21 = vld [vmem:[%s2335_s1 + $0x90] sm:$0xff]  ;;  %v165_v22 = vld [vmem:[%s2335_s1 + $0x98] sm:$0xff]  ;;  %v166_v23 = vld [vmem:[%s2335_s1 + $0xa0] sm:$0xff] }
  0x1b   :  { %1693 = vmatprep.mubr.msk.f32.mxu0 %vm186_vm0, %v148_v5  ;;  %v167_v24 = vld [vmem:[%s2335_s1 + $0xa8] sm:$0xff]  ;;  %v168_v25 = vld [vmem:[%s2335_s1 + $0xb0] sm:$0xff]  ;;  %v169_v26 = vld [vmem:[%s2335_s1 + $0xb8] sm:$0xff] }
  0x1c   :  { %v170_v27 = vld [vmem:[%s2335_s1 + $0xc0] sm:$0xff]  ;;  %v171_v28 = vld [vmem:[%s2335_s1 + $0xc8] sm:$0xff]  ;;  %v172_v29 = vld [vmem:[%s2335_s1 + $0xd0] sm:$0xff] }
  0x1d   :  { %v173_v30 = vld [vmem:[%s2335_s1 + $0xd8] sm:$0xff]  ;;  %v174_v31 = vld [vmem:[%s2335_s1 + $0xe0] sm:$0xff]  ;;  %v175_v32 = vld [vmem:[%s2335_s1 + $0xe8] sm:$0xff] }
  0x1e   :  { %1694 = vmatmul.mubr.msk.f32.gmra.mrb[2].mxu0 %vm186_vm0, %v149_v6  ;;  %v176_v33 = vld [vmem:[%s2335_s1 + $0xf0] sm:$0xff]  ;;  %v177_v34 = vld [vmem:[%s2335_s1 + $0xf8] sm:$0xff]  ;;  %v178_v35 = vld [vmem:[%s2335_s1 + $0x100] sm:$0xff] }
  0x1f   :  { %1696 = vmatprep.mubr.msk.f32.mxu0 %vm186_vm0, %v150_v7  ;;  %v179_v36 = vld [vmem:[%s2335_s1 + $0x108] sm:$0xff]  ;;  %v180_v37 = vld [vmem:[%s2335_s1 + $0x110] sm:$0xff]  ;;  %v181_v38 = vld [vmem:[%s2335_s1 + $0x118] sm:$0xff] }
  0x20   :  { %v182_v39 = vld [vmem:[%s2335_s1 + $0x120] sm:$0xff]  ;;  %v183_v40 = vld [vmem:[%s2335_s1 + $0x128] sm:$0xf]  ;;  %v33_v42 = vld [vmem:[#allocation3 + $0x8] sm:$0xff] }
  0x21   :  { %v54_v43 = vld [vmem:[#allocation3 + $0xb0] sm:$0xff]  ;;  %vm1877_vm3 = vmpackc.low %vm671_vm1, %vm1974_vm2 }
  0x22   :  { %1697 = vmatmul.mubr.msk.f32.gmra.mrb[4].mxu0 %vm186_vm0, %v151_v8  ;;  %774 = vmatprep.mubr.f32.mxu1 %v54_v43  ;;  %v59_v43 = vld [vmem:[#allocation3 + $0xd8] sm:$0xff] }
  0x23   :  { %1699 = vmatprep.mubr.msk.f32.mxu0 %vm186_vm0, %v152_v9 }
  0x26   :  { %1700 = vmatmul.mubr.msk.f32.gmra.mrb[6].mxu0 %vm186_vm0, %v153_v10 }
  0x27   :  { %1702 = vmatprep.mubr.msk.f32.mxu0 %vm186_vm0, %v154_v11 }
  0x2a   :  { %1703 = vmatmul.mubr.msk.f32.gmra.mrb[8].mxu0 %vm186_vm0, %v155_v12 }
  0x2b   :  { %1705 = vmatprep.mubr.msk.f32.mxu0 %vm186_vm0, %v156_v13 }
  0x2e   :  { %1706 = vmatmul.mubr.msk.f32.gmra.mrb[10].mxu0 %vm186_vm0, %v157_v14 }
  0x2f   :  { %1708 = vmatprep.mubr.msk.f32.mxu0 %vm186_vm0, %v158_v15 }
  0x32   :  { %1709 = vmatmul.mubr.msk.f32.gmra.mrb[12].mxu0 %vm186_vm0, %v159_v16 }
  0x33   :  { %1711 = vmatprep.mubr.msk.f32.mxu0 %vm186_vm0, %v160_v17 }
  0x36   :  { %1712 = vmatmul.mubr.msk.f32.gmra.mrb[14].mxu0 %vm186_vm0, %v161_v18 }
  0x37   :  { %1714 = vmatprep.mubr.msk.f32.mxu0 %vm186_vm0, %v162_v19 }
  0x3a   :  { %1715 = vmatmul.mubr.msk.f32.gmra.mrb[16].mxu0 %vm186_vm0, %v163_v20 }
  0x3b   :  { %1717 = vmatprep.mubr.msk.f32.mxu0 %vm186_vm0, %v164_v21 }
  0x3e   :  { %1718 = vmatmul.mubr.msk.f32.gmra.mrb[18].mxu0 %vm186_vm0, %v165_v22 }
  0x3f   :  { %1720 = vmatprep.mubr.msk.f32.mxu0 %vm186_vm0, %v166_v23 }
  0x42   :  { %1721 = vmatmul.mubr.msk.f32.gmra.mrb[20].mxu0 %vm186_vm0, %v167_v24 }
  0x43   :  { %1723 = vmatprep.mubr.msk.f32.mxu0 %vm186_vm0, %v168_v25 }
  0x46   :  { %1724 = vmatmul.mubr.msk.f32.gmra.mrb[22].mxu0 %vm186_vm0, %v169_v26 }
  0x47   :  { %1726 = vmatprep.mubr.msk.f32.mxu0 %vm186_vm0, %v170_v27 }
  0x4a   :  { %1727 = vmatmul.mubr.msk.f32.gmra.mrb[24].mxu0 %vm186_vm0, %v171_v28  ;;  %v32_v28 = vld [vmem:[#allocation3] sm:$0xff] }
  0x4b   :  { %1729 = vmatprep.mubr.msk.f32.mxu0 %vm186_vm0, %v172_v29  ;;  %v53_v29 = vld [vmem:[#allocation3 + $0xa8] sm:$0xff] }
  0x4e   :  { %1730 = vmatmul.mubr.msk.f32.gmra.mrb[26].mxu0 %vm186_vm0, %v173_v30 }
  0x4f   :  { %1732 = vmatprep.mubr.msk.f32.mxu0 %vm186_vm0, %v174_v31  ;;  %v36_v31 = vld [vmem:[#allocation3 + $0x20] sm:$0xff] }
  0x52   :  { %1733 = vmatmul.mubr.msk.f32.gmra.mrb[28].mxu0 %vm186_vm0, %v175_v32  ;;  %v57_v32 = vld [vmem:[#allocation3 + $0xc8] sm:$0xff] }
  0x53   :  { %1735 = vmatprep.mubr.msk.f32.mxu0 %vm186_vm0, %v176_v33 }
  0x56   :  { %1736 = vmatmul.mubr.msk.f32.gmra.mrb[30].mxu0 %vm186_vm0, %v177_v34 }
  0x57   :  { %1738 = vmatprep.mubr.msk.f32.mxu0 %vm186_vm0, %v178_v35  ;;  %v35_v35 = vld [vmem:[#allocation3 + $0x18] sm:$0xff] }
  0x5a   :  { %1739 = vmatmul.mubr.msk.f32.gmra.mrb[32].mxu0 %vm186_vm0, %v179_v36  ;;  %v56_v36 = vld [vmem:[#allocation3 + $0xc0] sm:$0xff] }
  0x5b   :  { %1741 = vmatprep.mubr.msk.f32.mxu0 %vm186_vm0, %v180_v37 }
  0x5e   :  { %1742 = vmatmul.mubr.msk.f32.gmra.mrb[34].mxu0 %vm186_vm0, %v181_v38  ;;  %v39_v38 = vld [vmem:[#allocation3 + $0x38] sm:$0xff] }
  0x5f   :  { %1744 = vmatprep.mubr.msk.f32.mxu0 %vm186_vm0, %v182_v39  ;;  %v60_v39 = vld [vmem:[#allocation3 + $0xe0] sm:$0xff] }
  0x62   :  { %1745 = vmatmul.mubr.msk.f32.gmra.mrb[36].mxu0 %vm186_vm0, %v183_v40 }
  0x63   :  { %739 = vmatprep.mubr.f32.mxu0 %v33_v42  ;;  %v38_v42 = vld [vmem:[#allocation3 + $0x30] sm:$0xff] }
  0xed   :  { %v1692_v44 = vpop.f32.mrb[0].mxu0 }
  0xee   :  { %v367_v45 = vpop.f32.mrb[1].mxu0 }
  0xef   :  { %v1821_v46 = vpack.c.bf16 %v1692_v44, %v367_v45  ;;  %v42_v45 = vld [vmem:[#allocation3 + $0x50] sm:$0xff] }
  0xf1   :  { %v1695_v47 = vpop.f32.mrb[2].mxu0  ;;  %1822 = vmatpush1.bf16.msra.mxu0 %v1821_v46  ;;  %1898 = vmatpush1.bf16.msra.mxu1 %v1821_v46  ;;  %v63_v46 = vld [vmem:[#allocation3 + $0xf8] sm:$0xff] }
  0xf2   :  { %v377_v48 = vpop.f32.mrb[3].mxu0  ;;  %1823 = vmatprep.subr.bf16.mxu0 %v1973_v41  ;;  %1883 = vmatprep.subr.bf16.mxu1 %v1973_v41 }
  0xf3   :  { %v1824_v49 = vpack.c.bf16 %v1695_v47, %v377_v48 }
  0xf5   :  { %v1698_v50 = vpop.f32.mrb[4].mxu0  ;;  %1825 = vmatpush1.bf16.msra.mxu0 %v1824_v49  ;;  %1899 = vmatpush1.bf16.msra.mxu1 %v1824_v49  ;;  %v41_v49 = vld [vmem:[#allocation3 + $0x48] sm:$0xff] }
  0xf6   :  { %v387_v51 = vpop.f32.mrb[5].mxu0  ;;  %1826 = vmatprep.subr.bf16.mxu0 %v1973_v41  ;;  %1884 = vmatprep.subr.bf16.mxu1 %v1973_v41 }
  0xf7   :  { %v1827_v52 = vpack.c.bf16 %v1698_v50, %v387_v51  ;;  %v62_v50 = vld [vmem:[#allocation3 + $0xf0] sm:$0xff]  ;;  %v45_v51 = vld [vmem:[#allocation3 + $0x68] sm:$0xff] }
  0xf9   :  { %v1701_v53 = vpop.f32.mrb[6].mxu0  ;;  %1828 = vmatpush1.bf16.msra.mxu0 %v1827_v52  ;;  %1900 = vmatpush1.bf16.msra.mxu1 %v1827_v52  ;;  %v66_v52 = vld [vmem:[#allocation3 + $0x110] sm:$0xff] }
  0xfa   :  { %v397_v54 = vpop.f32.mrb[7].mxu0  ;;  %1829 = vmatprep.subr.bf16.mxu0 %v1973_v41  ;;  %1885 = vmatprep.subr.bf16.mxu1 %v1973_v41 }
  0xfb   :  { %v1830_v55 = vpack.c.bf16 %v1701_v53, %v397_v54  ;;  %v44_v53 = vld [vmem:[#allocation3 + $0x60] sm:$0xff]  ;;  %v65_v54 = vld [vmem:[#allocation3 + $0x108] sm:$0xff] }
  0xfd   :  { %v1704_v56 = vpop.f32.mrb[8].mxu0  ;;  %1831 = vmatpush1.bf16.msra.mxu0 %v1830_v55  ;;  %1901 = vmatpush1.bf16.msra.mxu1 %v1830_v55  ;;  %v48_v55 = vld [vmem:[#allocation3 + $0x80] sm:$0xff] }
  0xfe   :  { %v407_v57 = vpop.f32.mrb[9].mxu0  ;;  %1832 = vmatprep.subr.bf16.mxu0 %v1973_v41  ;;  %1886 = vmatprep.subr.bf16.mxu1 %v1973_v41 }
  0xff   :  { %v1833_v58 = vpack.c.bf16 %v1704_v56, %v407_v57  ;;  %v69_v56 = vld [vmem:[#allocation3 + $0x128] sm:$0xff]  ;;  %v47_v57 = vld [vmem:[#allocation3 + $0x78] sm:$0xff] }
 0x101   :  { %v1707_v59 = vpop.f32.mrb[10].mxu0  ;;  %1834 = vmatpush1.bf16.msra.mxu0 %v1833_v58  ;;  %1902 = vmatpush1.bf16.msra.mxu1 %v1833_v58  ;;  %v68_v58 = vld [vmem:[#allocation3 + $0x120] sm:$0xff] }
 0x102   :  { %v417_v60 = vpop.f32.mrb[11].mxu0  ;;  %1835 = vmatprep.subr.bf16.mxu0 %v1973_v41  ;;  %1887 = vmatprep.subr.bf16.mxu1 %v1973_v41 }
 0x103   :  { %v1836_v61 = vpack.c.bf16 %v1707_v59, %v417_v60  ;;  %v51_v59 = vld [vmem:[#allocation3 + $0x98] sm:$0xff]  ;;  %v72_v60 = vld [vmem:[#allocation3 + $0x140] sm:$0xff] }
 0x105   :  { %v1710_v62 = vpop.f32.mrb[12].mxu0  ;;  %1837 = vmatpush1.bf16.msra.mxu0 %v1836_v61  ;;  %1903 = vmatpush1.bf16.msra.mxu1 %v1836_v61  ;;  %v50_v61 = vld [vmem:[#allocation3 + $0x90] sm:$0xff] }
 0x106   :  { %v427_v63 = vpop.f32.mrb[13].mxu0  ;;  %1838 = vmatprep.subr.bf16.mxu0 %v1973_v41  ;;  %1888 = vmatprep.subr.bf16.mxu1 %v1973_v41 }
 0x107   :  { %v1839_v0 = vpack.c.bf16 %v1710_v62, %v427_v63  ;;  %v71_v62 = vld [vmem:[#allocation3 + $0x138] sm:$0xff] }
 0x108   :  { %v75_v63 = vld [vmem:[#allocation3 + $0x158] sm:$0xff] }
 0x109   :  { %v1713_v1 = vpop.f32.mrb[14].mxu0  ;;  %1840 = vmatpush1.bf16.msra.mxu0 %v1839_v0  ;;  %1904 = vmatpush1.bf16.msra.mxu1 %v1839_v0  ;;  %v34_v0 = vld [vmem:[#allocation3 + $0x10] sm:$0xff] }
 0x10a   :  { %v437_v2 = vpop.f32.mrb[15].mxu0  ;;  %1841 = vmatprep.subr.bf16.mxu0 %v1973_v41  ;;  %1889 = vmatprep.subr.bf16.mxu1 %v1973_v41 }
 0x10b   :  { %v1842_v3 = vpack.c.bf16 %v1713_v1, %v437_v2  ;;  %v74_v1 = vld [vmem:[#allocation3 + $0x150] sm:$0xff]  ;;  %v37_v2 = vld [vmem:[#allocation3 + $0x28] sm:$0xff] }
 0x10d   :  { %v1716_v4 = vpop.f32.mrb[16].mxu0  ;;  %1843 = vmatpush1.bf16.msra.mxu0 %v1842_v3  ;;  %1905 = vmatpush1.bf16.msra.mxu1 %v1842_v3  ;;  %v78_v3 = vld [vmem:[#allocation3 + $0x170] sm:$0xff] }
 0x10e   :  { %v447_v5 = vpop.f32.mrb[17].mxu0  ;;  %1844 = vmatprep.subr.bf16.mxu0 %v1973_v41  ;;  %1890 = vmatprep.subr.bf16.mxu1 %v1973_v41 }
 0x10f   :  { %v1845_v6 = vpack.c.bf16 %v1716_v4, %v447_v5  ;;  %v40_v4 = vld [vmem:[#allocation3 + $0x40] sm:$0xff]  ;;  %v77_v5 = vld [vmem:[#allocation3 + $0x168] sm:$0xff] }
 0x111   :  { %v1719_v7 = vpop.f32.mrb[18].mxu0  ;;  %1846 = vmatpush1.bf16.msra.mxu0 %v1845_v6  ;;  %1906 = vmatpush1.bf16.msra.mxu1 %v1845_v6  ;;  %v43_v6 = vld [vmem:[#allocation3 + $0x58] sm:$0xff] }
 0x112   :  { %v457_v8 = vpop.f32.mrb[19].mxu0  ;;  %1847 = vmatprep.subr.bf16.mxu0 %v1973_v41  ;;  %1891 = vmatprep.subr.bf16.mxu1 %v1973_v41 }
 0x113   :  { %v1848_v9 = vpack.c.bf16 %v1719_v7, %v457_v8  ;;  %v81_v7 = vld [vmem:[#allocation3 + $0x188] sm:$0xff]  ;;  %v46_v8 = vld [vmem:[#allocation3 + $0x70] sm:$0xff] }
 0x115   :  { %v1722_v10 = vpop.f32.mrb[20].mxu0  ;;  %1849 = vmatpush1.bf16.msra.mxu0 %v1848_v9  ;;  %1907 = vmatpush1.bf16.msra.mxu1 %v1848_v9  ;;  %v80_v9 = vld [vmem:[#allocation3 + $0x180] sm:$0xff] }
 0x116   :  { %v467_v11 = vpop.f32.mrb[21].mxu0  ;;  %1850 = vmatprep.subr.bf16.mxu0 %v1973_v41  ;;  %1892 = vmatprep.subr.bf16.mxu1 %v1973_v41 }
 0x117   :  { %v1851_v12 = vpack.c.bf16 %v1722_v10, %v467_v11  ;;  %v49_v10 = vld [vmem:[#allocation3 + $0x88] sm:$0xff]  ;;  %v84_v11 = vld [vmem:[#allocation3 + $0x1a0] sm:$0xff] }
 0x119   :  { %v1725_v13 = vpop.f32.mrb[22].mxu0  ;;  %1852 = vmatpush1.bf16.msra.mxu0 %v1851_v12  ;;  %1908 = vmatpush1.bf16.msra.mxu1 %v1851_v12  ;;  %v52_v12 = vld [vmem:[#allocation3 + $0xa0] sm:$0xff] }
 0x11a   :  { %v477_v14 = vpop.f32.mrb[23].mxu0  ;;  %1853 = vmatprep.subr.bf16.mxu0 %v1973_v41  ;;  %1893 = vmatprep.subr.bf16.mxu1 %v1973_v41 }
 0x11b   :  { %v1854_v15 = vpack.c.bf16 %v1725_v13, %v477_v14  ;;  %v83_v13 = vld [vmem:[#allocation3 + $0x198] sm:$0xff] }
 0x11c   :  { %v55_v14 = vld [vmem:[#allocation3 + $0xb8] sm:$0xff] }
 0x11d   :  { %v1728_v16 = vpop.f32.mrb[24].mxu0  ;;  %1855 = vmatpush1.bf16.msra.mxu0 %v1854_v15  ;;  %1909 = vmatpush1.bf16.msra.mxu1 %v1854_v15  ;;  %v87_v15 = vld [vmem:[#allocation3 + $0x1b8] sm:$0xff] }
 0x11e   :  { %v487_v17 = vpop.f32.mrb[25].mxu0  ;;  %1856 = vmatprep.subr.bf16.mxu0 %v1973_v41  ;;  %1894 = vmatprep.subr.bf16.mxu1 %v1973_v41 }
 0x11f   :  { %v1857_v18 = vpack.c.bf16 %v1728_v16, %v487_v17  ;;  %v58_v16 = vld [vmem:[#allocation3 + $0xd0] sm:$0xff] }
 0x120   :  { %v86_v17 = vld [vmem:[#allocation3 + $0x1b0] sm:$0xff] }
 0x121   :  { %v1731_v19 = vpop.f32.mrb[26].mxu0  ;;  %1858 = vmatpush1.bf16.msra.mxu0 %v1857_v18  ;;  %1910 = vmatpush1.bf16.msra.mxu1 %v1857_v18  ;;  %v61_v18 = vld [vmem:[#allocation3 + $0xe8] sm:$0xff] }
 0x122   :  { %v497_v20 = vpop.f32.mrb[27].mxu0  ;;  %1859 = vmatprep.subr.bf16.mxu0 %v1973_v41  ;;  %1895 = vmatprep.subr.bf16.mxu1 %v1973_v41 }
 0x123   :  { %v1860_v21 = vpack.c.bf16 %v1731_v19, %v497_v20  ;;  %v90_v19 = vld [vmem:[#allocation3 + $0x1d0] sm:$0xff]  ;;  %v64_v20 = vld [vmem:[#allocation3 + $0x100] sm:$0xff] }
 0x125   :  { %v1734_v22 = vpop.f32.mrb[28].mxu0  ;;  %1861 = vmatpush1.bf16.msra.mxu0 %v1860_v21  ;;  %1911 = vmatpush1.bf16.msra.mxu1 %v1860_v21  ;;  %v89_v21 = vld [vmem:[#allocation3 + $0x1c8] sm:$0xff] }
 0x126   :  { %v507_v23 = vpop.f32.mrb[29].mxu0  ;;  %1862 = vmatprep.subr.bf16.mxu0 %v1973_v41  ;;  %1896 = vmatprep.subr.bf16.mxu1 %v1973_v41 }
 0x127   :  { %v1863_v24 = vpack.c.bf16 %v1734_v22, %v507_v23  ;;  %v67_v22 = vld [vmem:[#allocation3 + $0x118] sm:$0xff]  ;;  %v93_v23 = vld [vmem:[#allocation3 + $0x1e8] sm:$0xff] }
 0x129   :  { %v1737_v25 = vpop.f32.mrb[30].mxu0  ;;  %1864 = vmatpush1.bf16.msra.mxu0 %v1863_v24  ;;  %1912 = vmatpush1.bf16.msra.mxu1 %v1863_v24  ;;  %v70_v24 = vld [vmem:[#allocation3 + $0x130] sm:$0xff] }
 0x12a   :  { %v517_v26 = vpop.f32.mrb[31].mxu0  ;;  %1865 = vmatprep.subr.bf16.mxu0 %v1973_v41  ;;  %1897 = vmatprep.subr.bf16.mxu1 %v1973_v41 }
 0x12b   :  { %v1866_v27 = vpack.c.bf16 %v1737_v25, %v517_v26  ;;  %v92_v25 = vld [vmem:[#allocation3 + $0x1e0] sm:$0xff]  ;;  %v73_v26 = vld [vmem:[#allocation3 + $0x148] sm:$0xff] }
 0x12d   :  { %1867 = vmatpush1.bf16.msra.mxu0 %v1866_v27  ;;  %1913 = vmatpush1.bf16.msra.mxu1 %v1866_v27  ;;  %v1740_v30 = vpop.f32.mrb[32].mxu0  ;;  %v96_v27 = vld [vmem:[#allocation3 + $0x200] sm:$0xff] }
 0x12e   :  { %v527_v33 = vpop.f32.mrb[33].mxu0 }
 0x12f   :  { %v1868_v34 = vpack.c.bf16 %v1740_v30, %v527_v33  ;;  %v79_v30 = vld [vmem:[#allocation3 + $0x178] sm:$0xff]  ;;  %v98_v33 = vld [vmem:[#allocation3 + $0x210] sm:$0xff] }
 0x130   :  { %740 = vmatmul.mubr.f32.vlgmr.msra.gmra.mrb[38].mxu0 %v32_v28  ;;  %775 = vmatmul.mubr.f32.vlgmr.msra.gmra.mrb[0].mxu1 %v53_v29  ;;  %v76_v28 = vld [vmem:[#allocation3 + $0x160] sm:$0xff]  ;;  %v95_v29 = vld [vmem:[#allocation3 + $0x1f8] sm:$0xff] }
 0x131   :  { %744 = vmatprep.mubr.f32.mxu0 %v36_v31  ;;  %779 = vmatprep.mubr.f32.mxu1 %v57_v32  ;;  %v1743_v37 = vpop.f32.mrb[34].mxu0  ;;  %v99_v31 = vld [vmem:[#allocation3 + $0x218] sm:$0xff]  ;;  %v82_v32 = vld [vmem:[#allocation3 + $0x190] sm:$0xff] }
 0x132   :  { %1869 = vmatprep.subr.bf16.mxu0 %v1868_v34  ;;  %v537_v40 = vpop.f32.mrb[35].mxu0 }
 0x133   :  { %v1872_v41 = vpack.c.bf16 %v1743_v37, %v537_v40  ;;  %1871 = vmatpush3.bf16.msra.mxu0 %v1868_v34  ;;  %v85_v34 = vld [vmem:[#allocation3 + $0x1a8] sm:$0xff]  ;;  %v94_v40 = vld [vmem:[#allocation3 + $0x1f0] sm:$0xff] }
 0x134   :  { %745 = vmatmul.mubr.f32.gmra.mrb[40].mxu0 %v35_v35  ;;  %780 = vmatmul.mubr.f32.gmra.mrb[2].mxu1 %v56_v36  ;;  %v102_v35 = vld [vmem:[#allocation3 + $0x230] sm:$0xff]  ;;  %v88_v36 = vld [vmem:[#allocation3 + $0x1c0] sm:$0xff]  ;;  %v101_v37 = vld [vmem:[#allocation3 + $0x228] sm:$0xff] }
 0x135   :  { %749 = vmatprep.mubr.f32.mxu0 %v39_v38  ;;  %784 = vmatprep.mubr.f32.mxu1 %v60_v39  ;;  %v1746_v44 = vpop.f32.mrb[36].mxu0  ;;  %v91_v38 = vld [vmem:[#allocation3 + $0x1d8] sm:$0xff]  ;;  %v105_v39 = vld [vmem:[#allocation3 + $0x248] sm:$0xff] }
 0x136   :  { %1873 = vmatprep.subr.bf16.mxu0 %v1872_v41  ;;  %v547_v47 = vpop.f32.mrb[37].mxu0 }
 0x137   :  { %v1876_v48 = vpack.c.bf16 %v1746_v44, %v547_v47  ;;  %1875 = vmatpush3.bf16.msra.mxu0 %v1872_v41  ;;  %v104_v41 = vld [vmem:[#allocation3 + $0x240] sm:$0xff]  ;;  %v111_v47 = vld [vmem:[#allocation3 + $0x278] sm:$0xff] }
 0x138   :  { %750 = vmatmul.mubr.f32.gmra.mrb[42].mxu0 %v38_v42  ;;  %785 = vmatmul.mubr.f32.gmra.mrb[4].mxu1 %v59_v43  ;;  %v97_v42 = vld [vmem:[#allocation3 + $0x208] sm:$0xff]  ;;  %v108_v43 = vld [vmem:[#allocation3 + $0x260] sm:$0xff] }
 0x139   :  { %754 = vmatprep.mubr.f32.mxu0 %v42_v45  ;;  %789 = vmatprep.mubr.f32.mxu1 %v63_v46  ;;  %v100_v44 = vld [vmem:[#allocation3 + $0x220] sm:$0xff]  ;;  %v107_v45 = vld [vmem:[#allocation3 + $0x258] sm:$0xff] }
 0x13a   :  { %1878 = vmatprep.subr.msk.bf16.mxu0 %vm1877_vm3, %v1876_v48  ;;  %v103_v46 = vld [vmem:[#allocation3 + $0x238] sm:$0xff] }
 0x13b   :  { %1881 = vmatpush3.bf16.msk.msra.mxu0 %vm1877_vm3, %v1876_v48  ;;  %v106_v48 = vld [vmem:[#allocation3 + $0x250] sm:$0xff] }
 0x13c   :  { %755 = vmatmul.mubr.f32.gmra.mrb[44].mxu0 %v41_v49  ;;  %790 = vmatmul.mubr.f32.gmra.mrb[6].mxu1 %v62_v50  ;;  %v110_v49 = vld [vmem:[#allocation3 + $0x270] sm:$0xff]  ;;  %v109_v50 = vld [vmem:[#allocation3 + $0x268] sm:$0xff] }
 0x13d   :  { %759 = vmatprep.mubr.f32.mxu0 %v45_v51  ;;  %794 = vmatprep.mubr.f32.mxu1 %v66_v52  ;;  %v114_v51 = vld [vmem:[#allocation3 + $0x290] sm:$0xff]  ;;  %v112_v52 = vld [vmem:[#allocation3 + $0x280] sm:$0xff] }
 0x140   :  { %760 = vmatmul.mubr.f32.gmra.mrb[46].mxu0 %v44_v53  ;;  %795 = vmatmul.mubr.f32.gmra.mrb[8].mxu1 %v65_v54  ;;  %v113_v53 = vld [vmem:[#allocation3 + $0x288] sm:$0xff]  ;;  %v115_v54 = vld [vmem:[#allocation3 + $0x298] sm:$0xff] }
 0x141   :  { %764 = vmatprep.mubr.f32.mxu0 %v48_v55  ;;  %799 = vmatprep.mubr.f32.mxu1 %v69_v56  ;;  %v117_v55 = vld [vmem:[#allocation3 + $0x2a8] sm:$0xff]  ;;  %v118_v56 = vld [vmem:[#allocation3 + $0x2b0] sm:$0xff] }
 0x144   :  { %765 = vmatmul.mubr.f32.gmra.mrb[48].mxu0 %v47_v57  ;;  %800 = vmatmul.mubr.f32.gmra.mrb[10].mxu1 %v68_v58  ;;  %v116_v57 = vld [vmem:[#allocation3 + $0x2a0] sm:$0xff]  ;;  %v121_v58 = vld [vmem:[#allocation3 + $0x2c8] sm:$0xff] }
 0x145   :  { %769 = vmatprep.mubr.f32.mxu0 %v51_v59  ;;  %804 = vmatprep.mubr.f32.mxu1 %v72_v60  ;;  %v120_v59 = vld [vmem:[#allocation3 + $0x2c0] sm:$0xff] }
 0x146   :  { %v124_v60 = vld [vmem:[#allocation3 + $0x2e0] sm:$0xff] }
 0x148   :  { %770 = vmatmul.mubr.f32.gmra.mrb[50].mxu0 %v50_v61  ;;  %805 = vmatmul.mubr.f32.gmra.mrb[12].mxu1 %v71_v62  ;;  %v119_v61 = vld [vmem:[#allocation3 + $0x2b8] sm:$0xff] }
 0x149   :  { %809 = vmatprep.mubr.f32.mxu1 %v75_v63  ;;  %1759 = vmatprep.mubr.msk.f32.mxu0 %vm556_vm4, %v34_v0  ;;  %v127_v62 = vld [vmem:[#allocation3 + $0x2f8] sm:$0xff]  ;;  %v130_v0 = vld [vmem:[#allocation3 + $0x310] sm:$0xff] }
 0x14a   :  { %v123_v63 = vld [vmem:[#allocation3 + $0x2d8] sm:$0xff] }
 0x14c   :  { %810 = vmatmul.mubr.f32.gmra.mrb[14].mxu1 %v74_v1  ;;  %1760 = vmatmul.mubr.msk.f32.vlgmr.msra.gmra.mrb[52].mxu0 %vm556_vm4, %v37_v2  ;;  %v122_v1 = vld [vmem:[#allocation3 + $0x2d0] sm:$0xff]  ;;  %v133_v2 = vld [vmem:[#allocation3 + $0x328] sm:$0xff] }
 0x14d   :  { %814 = vmatprep.mubr.f32.mxu1 %v78_v3  ;;  %1762 = vmatprep.mubr.msk.f32.mxu0 %vm556_vm4, %v40_v4  ;;  %v126_v3 = vld [vmem:[#allocation3 + $0x2f0] sm:$0xff]  ;;  %v136_v4 = vld [vmem:[#allocation3 + $0x340] sm:$0xff] }
 0x150   :  { %815 = vmatmul.mubr.f32.gmra.mrb[16].mxu1 %v77_v5  ;;  %1763 = vmatmul.mubr.msk.f32.gmra.mrb[54].mxu0 %vm556_vm4, %v43_v6  ;;  %v125_v5 = vld [vmem:[#allocation3 + $0x2e8] sm:$0xff]  ;;  %v139_v6 = vld [vmem:[#allocation3 + $0x358] sm:$0xff] }
 0x151   :  { %819 = vmatprep.mubr.f32.mxu1 %v81_v7  ;;  %1765 = vmatprep.mubr.msk.f32.mxu0 %vm556_vm4, %v46_v8  ;;  %v129_v7 = vld [vmem:[#allocation3 + $0x308] sm:$0xff]  ;;  %v142_v8 = vld [vmem:[#allocation3 + $0x370] sm:$0xff] }
 0x154   :  { %820 = vmatmul.mubr.f32.gmra.mrb[18].mxu1 %v80_v9  ;;  %1766 = vmatmul.mubr.msk.f32.gmra.mrb[56].mxu0 %vm556_vm4, %v49_v10  ;;  %v128_v9 = vld [vmem:[#allocation3 + $0x300] sm:$0xff]  ;;  %v145_v10 = vld [vmem:[#allocation3 + $0x388] sm:$0xf] }
 0x155   :  { %824 = vmatprep.mubr.f32.mxu1 %v84_v11  ;;  %1768 = vmatprep.mubr.msk.f32.mxu0 %vm556_vm4, %v52_v12  ;;  %v132_v11 = vld [vmem:[#allocation3 + $0x320] sm:$0xff]  ;;  %v131_v12 = vld [vmem:[#allocation3 + $0x318] sm:$0xff] }
 0x158   :  { %825 = vmatmul.mubr.f32.gmra.mrb[20].mxu1 %v83_v13  ;;  %1769 = vmatmul.mubr.msk.f32.gmra.mrb[58].mxu0 %vm556_vm4, %v55_v14  ;;  %v135_v13 = vld [vmem:[#allocation3 + $0x338] sm:$0xff]  ;;  %v134_v14 = vld [vmem:[#allocation3 + $0x330] sm:$0xff] }
 0x159   :  { %829 = vmatprep.mubr.f32.mxu1 %v87_v15  ;;  %1771 = vmatprep.mubr.msk.f32.mxu0 %vm556_vm4, %v58_v16  ;;  %v138_v15 = vld [vmem:[#allocation3 + $0x350] sm:$0xff]  ;;  %v137_v16 = vld [vmem:[#allocation3 + $0x348] sm:$0xff] }
 0x15c   :  { %830 = vmatmul.mubr.f32.gmra.mrb[22].mxu1 %v86_v17  ;;  %1772 = vmatmul.mubr.msk.f32.gmra.mrb[60].mxu0 %vm556_vm4, %v61_v18  ;;  %v141_v17 = vld [vmem:[#allocation3 + $0x368] sm:$0xff]  ;;  %v140_v18 = vld [vmem:[#allocation3 + $0x360] sm:$0xff] }
 0x15d   :  { %834 = vmatprep.mubr.f32.mxu1 %v90_v19  ;;  %1774 = vmatprep.mubr.msk.f32.mxu0 %vm556_vm4, %v64_v20  ;;  %v144_v19 = vld [vmem:[#allocation3 + $0x380] sm:$0xf]  ;;  %v143_v20 = vld [vmem:[#allocation3 + $0x378] sm:$0xf] }
 0x160   :  { %835 = vmatmul.mubr.f32.gmra.mrb[24].mxu1 %v89_v21  ;;  %1775 = vmatmul.mubr.msk.f32.gmra.mrb[62].mxu0 %vm556_vm4, %v67_v22 }
 0x161   :  { %839 = vmatprep.mubr.f32.mxu1 %v93_v23  ;;  %1777 = vmatprep.mubr.msk.f32.mxu0 %vm556_vm4, %v70_v24 }
 0x164   :  { %840 = vmatmul.mubr.f32.gmra.mrb[26].mxu1 %v92_v25  ;;  %1778 = vmatmul.mubr.msk.f32.gmra.mrb[64].mxu0 %vm556_vm4, %v73_v26 }
 0x165   :  { %844 = vmatprep.mubr.f32.mxu1 %v96_v27  ;;  %1780 = vmatprep.mubr.msk.f32.mxu0 %vm556_vm4, %v76_v28 }
 0x168   :  { %845 = vmatmul.mubr.f32.gmra.mrb[28].mxu1 %v95_v29  ;;  %1781 = vmatmul.mubr.msk.f32.gmra.mrb[66].mxu0 %vm556_vm4, %v79_v30 }
 0x169   :  { %849 = vmatprep.mubr.f32.mxu1 %v99_v31  ;;  %1783 = vmatprep.mubr.msk.f32.mxu0 %vm556_vm4, %v82_v32 }
 0x16c   :  { %850 = vmatmul.mubr.f32.gmra.mrb[30].mxu1 %v98_v33  ;;  %1784 = vmatmul.mubr.msk.f32.gmra.mrb[68].mxu0 %vm556_vm4, %v85_v34 }
 0x16d   :  { %854 = vmatprep.mubr.f32.mxu1 %v102_v35  ;;  %1786 = vmatprep.mubr.msk.f32.mxu0 %vm556_vm4, %v88_v36 }
 0x170   :  { %855 = vmatmul.mubr.f32.gmra.mrb[32].mxu1 %v101_v37  ;;  %1787 = vmatmul.mubr.msk.f32.gmra.mrb[70].mxu0 %vm556_vm4, %v91_v38 }
 0x171   :  { %859 = vmatprep.mubr.f32.mxu1 %v105_v39  ;;  %1789 = vmatprep.mubr.msk.f32.mxu0 %vm556_vm4, %v94_v40 }
 0x174   :  { %860 = vmatmul.mubr.f32.gmra.mrb[34].mxu1 %v104_v41  ;;  %1790 = vmatmul.mubr.msk.f32.gmra.mrb[72].mxu0 %vm556_vm4, %v97_v42 }
 0x175   :  { %864 = vmatprep.mubr.f32.mxu1 %v108_v43  ;;  %1792 = vmatprep.mubr.msk.f32.mxu0 %vm556_vm4, %v100_v44 }
 0x178   :  { %865 = vmatmul.mubr.f32.gmra.mrb[36].mxu1 %v107_v45  ;;  %1793 = vmatmul.mubr.msk.f32.gmra.mrb[74].mxu0 %vm556_vm4, %v103_v46 }
 0x179   :  { %869 = vmatprep.mubr.f32.mxu1 %v111_v47  ;;  %1795 = vmatprep.mubr.msk.f32.mxu0 %vm556_vm4, %v106_v48 }
 0x17c   :  { %870 = vmatmul.mubr.f32.gmra.mrb[38].mxu1 %v110_v49  ;;  %1796 = vmatmul.mubr.msk.f32.gmra.mrb[76].mxu0 %vm556_vm4, %v109_v50 }
 0x17d   :  { %874 = vmatprep.mubr.f32.mxu1 %v114_v51  ;;  %1798 = vmatprep.mubr.msk.f32.mxu0 %vm556_vm4, %v112_v52  ;;  %v2262_v51 = vld [vmem:[%s2337_s3] ss:$0 sm:$0xff]  ;;  %s1975_s3 = smov [#allocation6]  }
 0x17e   :  { %s1512_s26 = sshll.u32 %s1975_s3, 4  ;;  %s1513_s26 = int_to_ptr.vmem [resolvable:$true] %s1512_s26 }
 0x17f   :  { %s1944_s27 = scalar_lea.vmem %s1513_s26, 4864  ;;  %p1949_p9 = scmp.lt.s32.totalorder %s1513_s26, %s1513_s26 }
 0x180   :  { %875 = vmatmul.mubr.f32.gmra.mrb[40].mxu1 %v113_v53  ;;  %1799 = vmatmul.mubr.msk.f32.gmra.mrb[78].mxu0 %vm556_vm4, %v115_v54  ;;  %p1945_p8 = scmp.ne.s32.totalorder %s1513_s26, %s1944_s27  ;;  %p1950_p10 = scmp.lt.s32.totalorder %s1944_s27, %s1944_s27 }
 0x181   :  { %879 = vmatprep.mubr.f32.mxu1 %v117_v55  ;;  %1801 = vmatprep.mubr.msk.f32.mxu0 %vm556_vm4, %v118_v56 }
 0x182   :  { %p1951_p11 = por %p1950_p10, %p1949_p9 }
 0x184   :  { %880 = vmatmul.mubr.f32.gmra.mrb[42].mxu1 %v116_v57  ;;  %1802 = vmatmul.mubr.msk.f32.gmra.mrb[80].mxu0 %vm556_vm4, %v121_v58  ;;  %p1952_p12 = pnand %p1951_p11, %p1945_p8 }
 0x185   :  { %884 = vmatprep.mubr.f32.mxu1 %v120_v59  ;;  %1804 = vmatprep.mubr.msk.f32.mxu0 %vm556_vm4, %v124_v60 }
 0x188   :  { %885 = vmatmul.mubr.f32.gmra.mrb[44].mxu1 %v119_v61  ;;  %1805 = vmatmul.mubr.msk.f32.gmra.mrb[82].mxu0 %vm556_vm4, %v127_v62 }
 0x189   :  { %889 = vmatprep.mubr.f32.mxu1 %v123_v63  ;;  %1807 = vmatprep.mubr.msk.f32.mxu0 %vm556_vm4, %v130_v0 }
 0x18c   :  { %890 = vmatmul.mubr.f32.gmra.mrb[46].mxu1 %v122_v1  ;;  %1808 = vmatmul.mubr.msk.f32.gmra.mrb[84].mxu0 %vm556_vm4, %v133_v2 }
 0x18d   :  { %894 = vmatprep.mubr.f32.mxu1 %v126_v3  ;;  %1810 = vmatprep.mubr.msk.f32.mxu0 %vm556_vm4, %v136_v4 }
 0x190   :  { %895 = vmatmul.mubr.f32.gmra.mrb[48].mxu1 %v125_v5  ;;  %1811 = vmatmul.mubr.msk.f32.gmra.mrb[86].mxu0 %vm556_vm4, %v139_v6 }
 0x191   :  { %899 = vmatprep.mubr.f32.mxu1 %v129_v7  ;;  %1813 = vmatprep.mubr.msk.f32.mxu0 %vm556_vm4, %v142_v8 }
 0x194   :  { %900 = vmatmul.mubr.f32.gmra.mrb[50].mxu1 %v128_v9  ;;  %1814 = vmatmul.mubr.msk.f32.gmra.mrb[88].mxu0 %vm556_vm4, %v145_v10 }
 0x195   :  { %904 = vmatprep.mubr.f32.mxu1 %v132_v11 }
 0x198   :  { %905 = vmatmul.mubr.f32.gmra.mrb[52].mxu1 %v131_v12 }
 0x199   :  { %909 = vmatprep.mubr.f32.mxu1 %v135_v13 }
 0x19c   :  { %910 = vmatmul.mubr.f32.gmra.mrb[54].mxu1 %v134_v14 }
 0x19d   :  { %914 = vmatprep.mubr.f32.mxu1 %v138_v15 }
 0x1a0   :  { %915 = vmatmul.mubr.f32.gmra.mrb[56].mxu1 %v137_v16 }
 0x1a1   :  { %919 = vmatprep.mubr.f32.mxu1 %v141_v17 }
 0x1a4   :  { %920 = vmatmul.mubr.f32.gmra.mrb[58].mxu1 %v140_v18 }
 0x1a5   :  { %924 = vmatprep.mubr.f32.mxu1 %v144_v19 }
 0x1a8   :  { %925 = vmatmul.mubr.f32.gmra.mrb[60].mxu1 %v143_v20 }
 0x203   :  { %v2243_v21 = vpop.f32.mrb[0].mxu1  ;;  %v741_v22 = vpop.f32.mrb[38].mxu0 }
 0x204   :  { %v778_v23 = vpop.f32.mrb[1].mxu1  ;;  %v743_v24 = vpop.f32.mrb[39].mxu0 }
 0x207   :  { %v2245_v25 = vpop.f32.mrb[2].mxu1  ;;  %v746_v26 = vpop.f32.mrb[40].mxu0 }
 0x208   :  { %v783_v27 = vpop.f32.mrb[3].mxu1  ;;  %v748_v28 = vpop.f32.mrb[41].mxu0 }
 0x20b   :  { %v2247_v29 = vpop.f32.mrb[4].mxu1  ;;  %v751_v30 = vpop.f32.mrb[42].mxu0 }
 0x20c   :  { %v788_v31 = vpop.f32.mrb[5].mxu1  ;;  %v753_v32 = vpop.f32.mrb[43].mxu0 }
 0x20f   :  { %v2249_v33 = vpop.f32.mrb[6].mxu1  ;;  %v756_v34 = vpop.f32.mrb[44].mxu0 }
 0x210   :  { %v793_v35 = vpop.f32.mrb[7].mxu1  ;;  %v758_v36 = vpop.f32.mrb[45].mxu0 }
 0x213   :  { %v2251_v37 = vpop.f32.mrb[8].mxu1  ;;  %v761_v38 = vpop.f32.mrb[46].mxu0 }
 0x214   :  { %v798_v39 = vpop.f32.mrb[9].mxu1  ;;  %v763_v40 = vpop.f32.mrb[47].mxu0 }
 0x217   :  { %v2253_v41 = vpop.f32.mrb[10].mxu1  ;;  %v766_v42 = vpop.f32.mrb[48].mxu0 }
 0x218   :  { %v803_v43 = vpop.f32.mrb[11].mxu1  ;;  %v768_v44 = vpop.f32.mrb[49].mxu0 }
 0x21b   :  { %v2255_v45 = vpop.f32.mrb[12].mxu1  ;;  %v771_v46 = vpop.f32.mrb[50].mxu0 }
 0x21c   :  { %v808_v47 = vpop.f32.mrb[13].mxu1  ;;  %v773_v48 = vpop.f32.mrb[51].mxu0 }
 0x21f   :  { %v2257_v49 = vpop.f32.mrb[14].mxu1  ;;  %v1761_v50 = vpop.f32.mrb[52].mxu0 }
 0x220   :  { %v1002_v52 = vadd.f32 %v1761_v50, %v746_v26  ;;  %v813_v53 = vpop.f32.mrb[15].mxu1  ;;  %v996_v54 = vpop.f32.mrb[53].mxu0 }
 0x221   :  { %v997_v55 = vadd.f32 %v996_v54, %v741_v22 }
 0x222   :  { %v1394_v56 = vadd.f32 %v2262_v51, %v1002_v52 }
 0x223   :  { %v1393_v57 = vadd.f32 %v2262_v51, %v997_v55  ;;  %v2266_v58 = vpop.f32.mrb[16].mxu1  ;;  %v1764_v59 = vpop.f32.mrb[54].mxu0 }
 0x224   :  { %v1432_v60 = vmax.f32 %v1394_v56, 0.0  ;;  %v1012_v61 = vadd.f32 %v1764_v59, %v756_v34  ;;  %v818_v62 = vpop.f32.mrb[17].mxu1  ;;  %v1006_v63 = vpop.f32.mrb[55].mxu0 }
 0x225   :  { %v1431_v0 = vmax.f32 %v1393_v57, 0.0  ;;  %v1007_v1 = vadd.f32 %v1006_v63, %v751_v30 }
 0x226   :  { %1470 = vst [vmem:[#allocation6 + $0x8] sm:$0xff] %v1432_v60  ;;  %v1396_v2 = vadd.f32 %v2262_v51, %v1012_v61 }
 0x227   :  { %1469 = vst [vmem:[#allocation6] sm:$0xff] %v1431_v0  ;;  %v1395_v3 = vadd.f32 %v2262_v51, %v1007_v1  ;;  %v2270_v4 = vpop.f32.mrb[18].mxu1  ;;  %v1767_v5 = vpop.f32.mrb[56].mxu0 }
 0x228   :  { %v1434_v6 = vmax.f32 %v1396_v2, 0.0  ;;  %v1022_v7 = vadd.f32 %v1767_v5, %v766_v42  ;;  %v823_v8 = vpop.f32.mrb[19].mxu1  ;;  %v1016_v9 = vpop.f32.mrb[57].mxu0 }
 0x229   :  { %v1433_v10 = vmax.f32 %v1395_v3, 0.0  ;;  %v1017_v11 = vadd.f32 %v1016_v9, %v761_v38 }
 0x22a   :  { %1472 = vst [vmem:[#allocation6 + $0x18] sm:$0xff] %v1434_v6  ;;  %v1398_v12 = vadd.f32 %v2262_v51, %v1022_v7 }
 0x22b   :  { %1471 = vst [vmem:[#allocation6 + $0x10] sm:$0xff] %v1433_v10  ;;  %v1397_v13 = vadd.f32 %v2262_v51, %v1017_v11  ;;  %v2274_v14 = vpop.f32.mrb[20].mxu1  ;;  %v1770_v15 = vpop.f32.mrb[58].mxu0 }
 0x22c   :  { %v1436_v16 = vmax.f32 %v1398_v12, 0.0  ;;  %v1032_v17 = vadd.f32 %v1770_v15, %v2243_v21  ;;  %v828_v18 = vpop.f32.mrb[21].mxu1  ;;  %v1026_v19 = vpop.f32.mrb[59].mxu0 }
 0x22d   :  { %v1435_v20 = vmax.f32 %v1397_v13, 0.0  ;;  %v1027_v22 = vadd.f32 %v1026_v19, %v771_v46 }
 0x22e   :  { %1474 = vst [vmem:[#allocation6 + $0x28] sm:$0xff] %v1436_v16  ;;  %v1400_v23 = vadd.f32 %v2262_v51, %v1032_v17 }
 0x22f   :  { %1473 = vst [vmem:[#allocation6 + $0x20] sm:$0xff] %v1435_v20  ;;  %v1399_v24 = vadd.f32 %v2262_v51, %v1027_v22  ;;  %v2279_v26 = vpop.f32.mrb[22].mxu1  ;;  %v1773_v27 = vpop.f32.mrb[60].mxu0 }
 0x230   :  { %v1438_v28 = vmax.f32 %v1400_v23, 0.0  ;;  %v1042_v30 = vadd.f32 %v1773_v27, %v2247_v29  ;;  %v833_v31 = vpop.f32.mrb[23].mxu1  ;;  %v1036_v32 = vpop.f32.mrb[61].mxu0 }
 0x231   :  { %v1437_v34 = vmax.f32 %v1399_v24, 0.0  ;;  %v1037_v21 = vadd.f32 %v1036_v32, %v2245_v25 }
 0x232   :  { %1476 = vst [vmem:[#allocation6 + $0x38] sm:$0xff] %v1438_v28  ;;  %v1402_v35 = vadd.f32 %v2262_v51, %v1042_v30 }
 0x233   :  { %1475 = vst [vmem:[#allocation6 + $0x30] sm:$0xff] %v1437_v34  ;;  %v1401_v36 = vadd.f32 %v2262_v51, %v1037_v21  ;;  %v836_v38 = vpop.f32.mrb[24].mxu1  ;;  %v1776_v39 = vpop.f32.mrb[62].mxu0 }
 0x234   :  { %v1440_v40 = vmax.f32 %v1402_v35, 0.0  ;;  %v1052_v42 = vadd.f32 %v1776_v39, %v2251_v37  ;;  %v838_v43 = vpop.f32.mrb[25].mxu1  ;;  %v1046_v44 = vpop.f32.mrb[63].mxu0 }
 0x235   :  { %v1439_v46 = vmax.f32 %v1401_v36, 0.0  ;;  %v1047_v29 = vadd.f32 %v1046_v44, %v2249_v33 }
 0x236   :  { %1478 = vst [vmem:[#allocation6 + $0x48] sm:$0xff] %v1440_v40  ;;  %v1404_v47 = vadd.f32 %v2262_v51, %v1052_v42 }
 0x237   :  { %1477 = vst [vmem:[#allocation6 + $0x40] sm:$0xff] %v1439_v46  ;;  %v1403_v25 = vadd.f32 %v2262_v51, %v1047_v29  ;;  %v841_v48 = vpop.f32.mrb[26].mxu1  ;;  %v1779_v50 = vpop.f32.mrb[64].mxu0 }
 0x238   :  { %v1442_v52 = vmax.f32 %v1404_v47, 0.0  ;;  %v1062_v53 = vadd.f32 %v1779_v50, %v2255_v45  ;;  %v843_v54 = vpop.f32.mrb[27].mxu1  ;;  %v1056_v55 = vpop.f32.mrb[65].mxu0 }
 0x239   :  { %v1441_v56 = vmax.f32 %v1403_v25, 0.0  ;;  %v1057_v37 = vadd.f32 %v1056_v55, %v2253_v41 }
 0x23a   :  { %1480 = vst [vmem:[#allocation6 + $0x58] sm:$0xff] %v1442_v52  ;;  %v1406_v57 = vadd.f32 %v2262_v51, %v1062_v53 }
 0x23b   :  { %1479 = vst [vmem:[#allocation6 + $0x50] sm:$0xff] %v1441_v56  ;;  %v1405_v33 = vadd.f32 %v2262_v51, %v1057_v37  ;;  %v846_v59 = vpop.f32.mrb[28].mxu1  ;;  %v1782_v60 = vpop.f32.mrb[66].mxu0 }
 0x23c   :  { %v1444_v61 = vmax.f32 %v1406_v57, 0.0  ;;  %v1072_v62 = vadd.f32 %v1782_v60, %v2266_v58  ;;  %v848_v63 = vpop.f32.mrb[29].mxu1  ;;  %v1066_v0 = vpop.f32.mrb[67].mxu0 }
 0x23d   :  { %v1443_v1 = vmax.f32 %v1405_v33, 0.0  ;;  %v1067_v45 = vadd.f32 %v1066_v0, %v2257_v49 }
 0x23e   :  { %1482 = vst [vmem:[#allocation6 + $0x68] sm:$0xff] %v1444_v61  ;;  %v1408_v2 = vadd.f32 %v2262_v51, %v1072_v62 }
 0x23f   :  { %1481 = vst [vmem:[#allocation6 + $0x60] sm:$0xff] %v1443_v1  ;;  %v1407_v41 = vadd.f32 %v2262_v51, %v1067_v45  ;;  %v851_v3 = vpop.f32.mrb[30].mxu1  ;;  %v1785_v5 = vpop.f32.mrb[68].mxu0 }
 0x240   :  { %v1446_v6 = vmax.f32 %v1408_v2, 0.0  ;;  %v1082_v7 = vadd.f32 %v1785_v5, %v2274_v14  ;;  %v853_v8 = vpop.f32.mrb[31].mxu1  ;;  %v1076_v9 = vpop.f32.mrb[69].mxu0 }
 0x241   :  { %v1445_v10 = vmax.f32 %v1407_v41, 0.0  ;;  %v1077_v58 = vadd.f32 %v1076_v9, %v2270_v4 }
 0x242   :  { %1484 = vst [vmem:[#allocation6 + $0x78] sm:$0xff] %v1446_v6  ;;  %v1410_v11 = vadd.f32 %v2262_v51, %v1082_v7 }
 0x243   :  { %1483 = vst [vmem:[#allocation6 + $0x70] sm:$0xff] %v1445_v10  ;;  %v1409_v49 = vadd.f32 %v2262_v51, %v1077_v58  ;;  %v856_v12 = vpop.f32.mrb[32].mxu1  ;;  %v1788_v13 = vpop.f32.mrb[70].mxu0 }
 0x244   :  { %v1448_v15 = vmax.f32 %v1410_v11, 0.0  ;;  %v1092_v16 = vadd.f32 %v1788_v13, %v836_v38  ;;  %v858_v17 = vpop.f32.mrb[33].mxu1  ;;  %v1086_v18 = vpop.f32.mrb[71].mxu0 }
 0x245   :  { %v1447_v19 = vmax.f32 %v1409_v49, 0.0  ;;  %v1087_v14 = vadd.f32 %v1086_v18, %v2279_v26 }
 0x246   :  { %1486 = vst [vmem:[#allocation6 + $0x88] sm:$0xff] %v1448_v15  ;;  %v1412_v20 = vadd.f32 %v2262_v51, %v1092_v16 }
 0x247   :  { %1485 = vst [vmem:[#allocation6 + $0x80] sm:$0xff] %v1447_v19  ;;  %v1411_v4 = vadd.f32 %v2262_v51, %v1087_v14  ;;  %v861_v22 = vpop.f32.mrb[34].mxu1  ;;  %v1791_v23 = vpop.f32.mrb[72].mxu0 }
 0x248   :  { %v1450_v24 = vmax.f32 %v1412_v20, 0.0  ;;  %v1102_v27 = vadd.f32 %v1791_v23, %v846_v59  ;;  %v863_v28 = vpop.f32.mrb[35].mxu1  ;;  %v1096_v30 = vpop.f32.mrb[73].mxu0 }
 0x249   :  { %v1449_v31 = vmax.f32 %v1411_v4, 0.0  ;;  %v1097_v32 = vadd.f32 %v1096_v30, %v841_v48 }
 0x24a   :  { %1488 = vst [vmem:[#allocation6 + $0x98] sm:$0xff] %v1450_v24  ;;  %v1414_v34 = vadd.f32 %v2262_v51, %v1102_v27 }
 0x24b   :  { %1487 = vst [vmem:[#allocation6 + $0x90] sm:$0xff] %v1449_v31  ;;  %v1413_v26 = vadd.f32 %v2262_v51, %v1097_v32  ;;  %v866_v21 = vpop.f32.mrb[36].mxu1  ;;  %v1794_v35 = vpop.f32.mrb[74].mxu0 }
 0x24c   :  { %v1452_v36 = vmax.f32 %v1414_v34, 0.0  ;;  %v1112_v38 = vadd.f32 %v1794_v35, %v856_v12  ;;  %v868_v39 = vpop.f32.mrb[37].mxu1  ;;  %v1106_v40 = vpop.f32.mrb[75].mxu0 }
 0x24d   :  { %v1451_v42 = vmax.f32 %v1413_v26, 0.0  ;;  %v1107_v43 = vadd.f32 %v1106_v40, %v851_v3 }
 0x24e   :  { %1490 = vst [vmem:[#allocation6 + $0xa8] sm:$0xff] %v1452_v36  ;;  %v1416_v44 = vadd.f32 %v2262_v51, %v1112_v38 }
 0x24f   :  { %1489 = vst [vmem:[#allocation6 + $0xa0] sm:$0xff] %v1451_v42  ;;  %v1415_v46 = vadd.f32 %v2262_v51, %v1107_v43  ;;  %v871_v29 = vpop.f32.mrb[38].mxu1  ;;  %v1797_v47 = vpop.f32.mrb[76].mxu0 }
 0x250   :  { %v1454_v25 = vmax.f32 %v1416_v44, 0.0  ;;  %v1122_v48 = vadd.f32 %v1797_v47, %v866_v21  ;;  %v873_v50 = vpop.f32.mrb[39].mxu1  ;;  %v1116_v52 = vpop.f32.mrb[77].mxu0 }
 0x251   :  { %v1453_v53 = vmax.f32 %v1415_v46, 0.0  ;;  %v1117_v54 = vadd.f32 %v1116_v52, %v861_v22 }
 0x252   :  { %1492 = vst [vmem:[#allocation6 + $0xb8] sm:$0xff] %v1454_v25  ;;  %v1418_v55 = vadd.f32 %v2262_v51, %v1122_v48 }
 0x253   :  { %1491 = vst [vmem:[#allocation6 + $0xb0] sm:$0xff] %v1453_v53  ;;  %v1417_v56 = vadd.f32 %v2262_v51, %v1117_v54  ;;  %v876_v37 = vpop.f32.mrb[40].mxu1  ;;  %v1800_v57 = vpop.f32.mrb[78].mxu0 }
 0x254   :  { %v1456_v33 = vmax.f32 %v1418_v55, 0.0  ;;  %v1132_v59 = vadd.f32 %v1800_v57, %v876_v37  ;;  %v878_v60 = vpop.f32.mrb[41].mxu1  ;;  %v1126_v61 = vpop.f32.mrb[79].mxu0 }
 0x255   :  { %v1455_v62 = vmax.f32 %v1417_v56, 0.0  ;;  %v1127_v63 = vadd.f32 %v1126_v61, %v871_v29 }
 0x256   :  { %1494 = vst [vmem:[#allocation6 + $0xc8] sm:$0xff] %v1456_v33  ;;  %v1420_v0 = vadd.f32 %v2262_v51, %v1132_v59 }
 0x257   :  { %1493 = vst [vmem:[#allocation6 + $0xc0] sm:$0xff] %v1455_v62  ;;  %v1419_v1 = vadd.f32 %v2262_v51, %v1127_v63  ;;  %v881_v45 = vpop.f32.mrb[42].mxu1  ;;  %v1803_v2 = vpop.f32.mrb[80].mxu0 }
 0x258   :  { %v1458_v41 = vmax.f32 %v1420_v0, 0.0  ;;  %v883_v3 = vpop.f32.mrb[43].mxu1  ;;  %v1136_v5 = vpop.f32.mrb[81].mxu0 }
 0x259   :  { %v1457_v6 = vmax.f32 %v1419_v1, 0.0  ;;  %v1137_v7 = vadd.f32 %v1136_v5, %v881_v45 }
 0x25a   :  { %1496 = vst [vmem:[#allocation6 + $0xd8] sm:$0xff] %v1458_v41 }
 0x25b   :  { %1495 = vst [vmem:[#allocation6 + $0xd0] sm:$0xff] %v1457_v6  ;;  %v1421_v8 = vadd.f32 %v2262_v51, %v1137_v7  ;;  %v886_v9 = vpop.f32.mrb[44].mxu1  ;;  %v1806_v10 = vpop.f32.mrb[82].mxu0 }
 0x25c   :  { %v1142_v58 = vadd.f32 %v1803_v2, %v886_v9  ;;  %v888_v11 = vpop.f32.mrb[45].mxu1  ;;  %v1146_v49 = vpop.f32.mrb[83].mxu0 }
 0x25d   :  { %v1459_v12 = vmax.f32 %v1421_v8, 0.0 }
 0x25e   :  { %v1422_v13 = vadd.f32 %v2262_v51, %v1142_v58 }
 0x25f   :  { %1497 = vst [vmem:[#allocation6 + $0xe0] sm:$0xff] %v1459_v12  ;;  %v891_v15 = vpop.f32.mrb[46].mxu1  ;;  %v1809_v16 = vpop.f32.mrb[84].mxu0 }
 0x260   :  { %v1460_v17 = vmax.f32 %v1422_v13, 0.0  ;;  %v1147_v18 = vadd.f32 %v1146_v49, %v891_v15  ;;  %v893_v19 = vpop.f32.mrb[47].mxu1  ;;  %v1156_v14 = vpop.f32.mrb[85].mxu0 }
 0x262   :  { %1498 = vst [vmem:[#allocation6 + $0xe8] sm:$0xff] %v1460_v17  ;;  %v1423_v20 = vadd.f32 %v2262_v51, %v1147_v18 }
 0x263   :  { %v896_v4 = vpop.f32.mrb[48].mxu1  ;;  %v1812_v22 = vpop.f32.mrb[86].mxu0 }
 0x264   :  { %v1461_v23 = vmax.f32 %v1423_v20, 0.0  ;;  %v1152_v24 = vadd.f32 %v1806_v10, %v896_v4  ;;  %v898_v27 = vpop.f32.mrb[49].mxu1  ;;  %v1166_v28 = vpop.f32.mrb[87].mxu0 }
 0x266   :  { %1499 = vst [vmem:[#allocation6 + $0xf0] sm:$0xff] %v1461_v23  ;;  %v1424_v30 = vadd.f32 %v2262_v51, %v1152_v24 }
 0x267   :  { %v901_v31 = vpop.f32.mrb[50].mxu1  ;;  %v1815_v32 = vpop.f32.mrb[88].mxu0 }
 0x268   :  { %v1462_v34 = vmax.f32 %v1424_v30, 0.0  ;;  %v1157_v26 = vadd.f32 %v1156_v14, %v901_v31  ;;  %v903_v21 = vpop.f32.mrb[51].mxu1  ;;  %v1176_v35 = vpop.f32.mrb[89].mxu0 }
 0x26a   :  { %1500 = vst [vmem:[#allocation6 + $0xf8] sm:$0xff] %v1462_v34  ;;  %v1425_v36 = vadd.f32 %v2262_v51, %v1157_v26 }
 0x26b   :  { %v906_v38 = vpop.f32.mrb[52].mxu1 }
 0x26c   :  { %v1463_v39 = vmax.f32 %v1425_v36, 0.0  ;;  %v1162_v40 = vadd.f32 %v1809_v16, %v906_v38  ;;  %v908_v42 = vpop.f32.mrb[53].mxu1 }
 0x26e   :  { %1501 = vst [vmem:[#allocation6 + $0x100] sm:$0xff] %v1463_v39  ;;  %v1426_v43 = vadd.f32 %v2262_v51, %v1162_v40 }
 0x26f   :  { %v911_v44 = vpop.f32.mrb[54].mxu1 }
 0x270   :  { %v1464_v46 = vmax.f32 %v1426_v43, 0.0  ;;  %v1167_v29 = vadd.f32 %v1166_v28, %v911_v44  ;;  %v913_v47 = vpop.f32.mrb[55].mxu1 }
 0x272   :  { %1502 = vst [vmem:[#allocation6 + $0x108] sm:$0xff] %v1464_v46  ;;  %v1427_v25 = vadd.f32 %v2262_v51, %v1167_v29 }
 0x273   :  { %v916_v48 = vpop.f32.mrb[56].mxu1 }
 0x274   :  { %v1465_v50 = vmax.f32 %v1427_v25, 0.0  ;;  %v1172_v52 = vadd.f32 %v1812_v22, %v916_v48  ;;  %v918_v53 = vpop.f32.mrb[57].mxu1 }
 0x276   :  { %1503 = vst [vmem:[#allocation6 + $0x110] sm:$0xff] %v1465_v50  ;;  %v1428_v54 = vadd.f32 %v2262_v51, %v1172_v52 }
 0x277   :  { %v921_v55 = vpop.f32.mrb[58].mxu1 }
 0x278   :  { %v1466_v56 = vmax.f32 %v1428_v54, 0.0  ;;  %v1177_v37 = vadd.f32 %v1176_v35, %v921_v55  ;;  %v923_v57 = vpop.f32.mrb[59].mxu1 }
 0x27a   :  { %1504 = vst [vmem:[#allocation6 + $0x118] sm:$0xff] %v1466_v56  ;;  %v1429_v33 = vadd.f32 %v2262_v51, %v1177_v37 }
 0x27b   :  { %v926_v59 = vpop.f32.mrb[60].mxu1 }
 0x27c   :  { %v1467_v60 = vmax.f32 %v1429_v33, 0.0  ;;  %v1182_v61 = vadd.f32 %v1815_v32, %v926_v59  ;;  %v928_v62 = vpop.f32.mrb[61].mxu1 }
 0x27e   :  { %1505 = vst [vmem:[#allocation6 + $0x120] sm:$0xff] %v1467_v60  ;;  %1226 = vst [vmem:[#allocation2 + $0x128] sm:$0xf] %v1182_v61 }
 0x285   :  { %v1385_v63 = vld [vmem:[#allocation2 + $0x128] sm:$0xf] }
 0x286   :  { %v1430_v0 = vadd.f32 %v2262_v51, %v1385_v63 }
 0x288   :  { %v1468_v1 = vmax.f32 %v1430_v0, 0.0 }
 0x28a   :  { %1506 = vst [vmem:[#allocation6 + $0x128] sm:$0xf] %v1468_v1 }
 0x28b   :  { %1955 = shalt.err (!%p1952_p12)
}
 0x28c   :  { %s1956_s30 = scalar_lea.hbm %s2338_s4, 4864 }
 0x28d   :  { %p1957_p13 = scmp.ne.s32.totalorder %s2338_s4, %s1956_s30  ;;  %p1960_p0 = scmp.lt.u32.totalorder %s1956_s30, %s2338_s4 }
 0x28f   :  { %p1962_p1 = pnand %p1960_p0, %p1957_p13 }
 0x291   :  { %1965 = shalt.err (!%p1962_p1)
}
 0x292   :  { %s1976_s0 = smov 128   ;;  %s1977_s9 = smov 8  }
 0x293   :  { %1518 = dma.vmem_to_hbm [thread:$0]  %s1513_s26, 4864, %s2338_s4, [#allocation5], %s1976_s0, %s1976_s0, %s1977_s9  }
 0x294   :  { %1968 = dma.done.wait [#allocation5], 4864  }
 0x295   :  { %1969 = vsyncadd [#allocation5], 4294962432 }
 0x296   :  { %1522 = vsyncpa [#allocation4], 1 }
 0x297   :  { %1523 = vsyncpa [#allocation5], 1 }

</bundles_post_ra>
